<compile_context>
chip_gen: v5e
topology: v5e:2x2
jax: 0.10.0
libtpu: 0.0.40
codegen_flags: <defaults>
</compile_context>

<pallas_src>
import functools
import math

import jax
import jax.numpy as jnp
from jax.experimental import pallas as pl
from jax.experimental.pallas import tpu as pltpu


def _round_up(x, m):
    return (x + m - 1) // m * m


def _pick_tk(kp):
    """K tile: prefer multiples of 256 (v6e/v7x MXU depth); 128 fallback."""
    for tk in (1024, 512, 256):
        if kp % tk == 0:
            return tk
    return 128


# ----------------------------- Pallas kernels -----------------------------

def _mm_bias_kernel(x_ref, w_ref, b_ref, o_ref, acc_ref, *, relu):
    """bf16 (TM,TK)@(TK,TN) with f32 accumulator, fused bias (+ReLU)."""
    k = pl.program_id(2)
    prod = jnp.dot(x_ref[...], w_ref[...], preferred_element_type=jnp.float32)

    @pl.when(k == 0)
    def _():
        acc_ref[...] = prod          # first K step: store directly (no zero+add)

    @pl.when(k > 0)
    def _():
        acc_ref[...] += prod

    @pl.when(k == pl.num_programs(2) - 1)
    def _():
        out = acc_ref[...] + b_ref[...]
        if relu:
            out = jnp.maximum(out, 0.0)
        o_ref[...] = out.astype(o_ref.dtype)


def _mm_bias_res_kernel(x_ref, w_ref, b_ref, r_ref, o_ref, acc_ref, *, relu):
    """Same as above but with the bottleneck residual add fused in."""
    k = pl.program_id(2)
    prod = jnp.dot(x_ref[...], w_ref[...], preferred_element_type=jnp.float32)

    @pl.when(k == 0)
    def _():
        acc_ref[...] = prod

    @pl.when(k > 0)
    def _():
        acc_ref[...] += prod

    @pl.when(k == pl.num_programs(2) - 1)
    def _():
        out = acc_ref[...] + b_ref[...] + r_ref[...].astype(jnp.float32)
        if relu:
            out = jnp.maximum(out, 0.0)
        o_ref[...] = out.astype(o_ref.dtype)


def _conv_tap_kernel(x_ref, w_ref, b_ref, o_ref, *, taps, mo, relu):
    """k*k-window conv as tap-folded matmuls on the flattened spatial layout.

    x_ref: (1, L, C)  flattened, spatially padded image (one batch element)
    w_ref: (T, C, TN) per-tap weight slabs (BN folded, bf16)
    b_ref: (1, TN)    f32 bias
    o_ref: (1, mo, TN) flattened output (pitch = padded input width;
                       garbage columns are sliced off by the caller)."""
    acc = jnp.dot(x_ref[0, pl.ds(taps[0], mo), :], w_ref[0],
                  preferred_element_type=jnp.float32)
    for t in range(1, len(taps)):
        acc = acc + jnp.dot(x_ref[0, pl.ds(taps[t], mo), :], w_ref[t],
                            preferred_element_type=jnp.float32)
    out = acc + b_ref[...]
    if relu:
        out = jnp.maximum(out, 0.0)
    o_ref[0] = out.astype(o_ref.dtype)


def _maxpool_tap_kernel(x_ref, o_ref, *, taps, mo):
    """3x3/stride-2 window max via 9 shifted slices of the flattened image."""
    acc = x_ref[0, pl.ds(taps[0], mo), :]
    for t in range(1, len(taps)):
        acc = jnp.maximum(acc, x_ref[0, pl.ds(taps[t], mo), :])
    o_ref[0] = acc


def _global_avgpool_kernel(x_ref, o_ref):
    # (N, H*W, TC) -> (N, TC), reduce in f32
    o_ref[...] = jnp.mean(x_ref[...].astype(jnp.float32), axis=1)


# ------------------------------ matmul wrapper -----------------------------

def matmul_fused(x, w_pad, b_pad, n_out, *, relu=False, residual=None,
                 out_dtype=jnp.bfloat16):
    """x:(M,K) @ pre-padded bf16 w:(Kp,Np) + f32 bias, fused ReLU / residual."""
    M, K = x.shape
    Kp, Np = w_pad.shape

    TM = 256 if M >= 256 else 128
    TN = 256 if Np % 256 == 0 else 128
    TK = _pick_tk(Kp)
    Mp = _round_up(M, TM)

    xp = x.astype(jnp.bfloat16)
    if (Mp, Kp) != (M, K):
        xp = jnp.pad(xp, ((0, Mp - M), (0, Kp - K)))

    in_specs = [
        pl.BlockSpec((TM, TK), lambda i, j, k: (i, k)),
        pl.BlockSpec((TK, TN), lambda i, j, k: (k, j)),
        pl.BlockSpec((1, TN), lambda i, j, k: (0, j)),
    ]
    operands = [xp, w_pad, b_pad]

    if residual is None:
        kernel = functools.partial(_mm_bias_kernel, relu=relu)
    else:
        rp = residual.astype(jnp.bfloat16)
        if rp.shape != (Mp, Np):
            rp = jnp.pad(rp, ((0, Mp - rp.shape[0]), (0, Np - rp.shape[1])))
        in_specs.append(pl.BlockSpec((TM, TN), lambda i, j, k: (i, j)))
        operands.append(rp)
        kernel = functools.partial(_mm_bias_res_kernel, relu=relu)

    cost = pl.CostEstimate(
        flops=2 * Mp * Kp * Np, transcendentals=0,
        bytes_accessed=(Mp * Kp + Kp * Np + Mp * Np) * 2)

    out = pl.pallas_call(
        kernel,
        out_shape=jax.ShapeDtypeStruct((Mp, Np), out_dtype),
        grid_spec=pltpu.PrefetchScalarGridSpec(
            num_scalar_prefetch=0,
            grid=(Mp // TM, Np // TN, Kp // TK),
            in_specs=in_specs,
            out_specs=pl.BlockSpec((TM, TN), lambda i, j, k: (i, j)),
            scratch_shapes=[pltpu.VMEM((TM, TN), jnp.float32)],
        ),
        compiler_params=pltpu.CompilerParams(
            dimension_semantics=("parallel", "parallel", "arbitrary"),
            vmem_limit_bytes=32 * 1024 * 1024),
        cost_estimate=cost,
    )(*operands)
    return out[:M, :n_out]


# --------------------- flattened-window helper (3x3 ops) -------------------

def _window_flatten(x, k, stride, pad, pad_value):
    """NHWC -> flattened, spatially padded layout + static tap offsets.

    Returns (xs, taps, mo, oh, ow, wp):
      xs   : (N, L, C) flattened padded image (stride-2: even rows of the
             flat index first, then odd rows).
      taps : per-tap static row offsets; tap t reads rows [taps[t], taps[t]+mo).
      Output row q = oh_idx*wp + ow_idx; columns ow_idx >= OW are garbage and
      are sliced off by the caller (extra slack rows are zero/pad_value)."""
    N, H, W, C = x.shape
    OH = (H + 2 * pad - k) // stride + 1
    OW = (W + 2 * pad - k) // stride + 1
    Hp, Wp = H + 2 * pad, W + 2 * pad
    xp = jnp.pad(x, ((0, 0), (pad, pad), (pad, pad), (0, 0)),
                 constant_values=pad_value)
    flat = xp.reshape(N, Hp * Wp, C)
    Mo = _round_up(OH * Wp, 8)
    offs = [di * Wp + dj for di in range(k) for dj in range(k)]
    if stride == 1:
        L = _round_up(max(Mo + max(offs), Hp * Wp), 8)
        xs = jnp.pad(flat, ((0, 0), (0, L - Hp * Wp), (0, 0)),
                     constant_values=pad_value)
        taps = tuple(offs)
    else:
        assert stride == 2
        Lh = _round_up(max((max(offs) >> 1) + 1 + Mo, (Hp * Wp + 1) // 2), 8)
        flat = jnp.pad(flat, ((0, 0), (0, 2 * Lh - Hp * Wp), (0, 0)),
                       constant_values=pad_value)
        xs = jnp.concatenate([flat[:, 0::2, :], flat[:, 1::2, :]], axis=1)
        taps = tuple((o & 1) * Lh + (o >> 1) for o in offs)
    return xs, taps, Mo, OH, OW, Wp


# ------------------------------ layer wrappers -----------------------------

def conv3x3_bn(x, p, stride, relu=True):
    """3x3 conv (+ folded BN, bias, ReLU) with the window folded in-kernel."""
    N, H, W, C = x.shape
    xs, taps, Mo, OH, OW, Wp = _window_flatten(
        x.astype(jnp.bfloat16), 3, stride, 1, 0.0)
    w, b, n_out = p['w'], p['b'], p['n']
    T, Cin, Np = w.shape
    assert T == 9 and Cin == C
    TN = 256 if Np % 256 == 0 else 128
    LL = xs.shape[1]

    cost = pl.CostEstimate(
        flops=2 * N * Mo * T * Cin * Np, transcendentals=0,
        bytes_accessed=N * (LL * C + Mo * Np) * 2 + T * Cin * Np * 2)

    out = pl.pallas_call(
        functools.partial(_conv_tap_kernel, taps=taps, mo=Mo, relu=relu),
        out_shape=jax.ShapeDtypeStruct((N, Mo, Np), jnp.bfloat16),
        grid_spec=pltpu.PrefetchScalarGridSpec(
            num_scalar_prefetch=0,
            grid=(N, Np // TN),
            in_specs=[
                pl.BlockSpec((1, LL, C), lambda n, j: (n, 0, 0)),
                pl.BlockSpec((T, Cin, TN), lambda n, j: (0, 0, j)),
                pl.BlockSpec((1, TN), lambda n, j: (0, j)),
            ],
            out_specs=pl.BlockSpec((1, Mo, TN), lambda n, j: (n, 0, j)),
        ),
        compiler_params=pltpu.CompilerParams(
            dimension_semantics=("parallel", "parallel"),
            vmem_limit_bytes=32 * 1024 * 1024),
        cost_estimate=cost,
    )(xs, w, b)
    # drop garbage columns (flat pitch Wp -> valid width OW) and channel pad
    out = out[:, :OH * Wp, :n_out].reshape(N, OH, Wp, n_out)[:, :, :OW, :]
    return out


def conv1x1_bn(x, p, relu, residual=None):
    """1x1 conv + folded BN (+ fused residual add and ReLU)."""
    N, H, W, C = x.shape
    cols = x.reshape(N * H * W, C)
    res2d = None
    if residual is not None:
        res2d = residual.reshape(N * H * W, residual.shape[-1])
    out = matmul_fused(cols, p['w'], p['b'], p['n'], relu=relu, residual=res2d)
    return out.reshape(N, H, W, p['n'])


def im2col(x, k, stride, pad):
    """(N,H,W,C) -> (N*OH*OW, k*k*C) patch matrix (stem 7x7 only)."""
    N, H, W, C = x.shape
    if pad:
        x = jnp.pad(x, ((0, 0), (pad, pad), (pad, pad), (0, 0)))
    OH = (H + 2 * pad - k) // stride + 1
    OW = (W + 2 * pad - k) // stride + 1
    cols = []
    for i in range(k):
        for j in range(k):
            cols.append(x[:, i:i + stride * OH:stride,
                          j:j + stride * OW:stride, :])
    patches = jnp.concatenate(cols, axis=-1)
    return patches.reshape(N * OH * OW, k * k * C), OH, OW


def conv_stem(x, p):
    # TODO(synk): fold the 7x7/stride-2 stem taps in-kernel as well.
    N = x.shape[0]
    cols, OH, OW = im2col(x, 7, 2, 3)
    out = matmul_fused(cols, p['w'], p['b'], p['n'], relu=True)
    return out.reshape(N, OH, OW, p['n'])


def maxpool3x3_s2p1(x):
    """MaxPool2d(kernel=3, stride=2, padding=1), full-image blocks per step."""
    N, H, W, C = x.shape
    xs, taps, Mo, OH, OW, Wp = _window_flatten(x, 3, 2, 1, -jnp.inf)
    LL = xs.shape[1]
    out = pl.pallas_call(
        functools.partial(_maxpool_tap_kernel, taps=taps, mo=Mo),
        out_shape=jax.ShapeDtypeStruct((N, Mo, C), x.dtype),
        grid_spec=pltpu.PrefetchScalarGridSpec(
            num_scalar_prefetch=0,
            grid=(N,),
            in_specs=[pl.BlockSpec((1, LL, C), lambda n: (n, 0, 0))],
            out_specs=pl.BlockSpec((1, Mo, C), lambda n: (n, 0, 0)),
        ),
        compiler_params=pltpu.CompilerParams(
            dimension_semantics=("parallel",)),
    )(xs)
    return out[:, :OH * Wp, :].reshape(N, OH, Wp, C)[:, :, :OW, :]


def global_avgpool(x):
    """AdaptiveAvgPool2d(1): (N,H,W,C) -> (N,C) f32, gridded over C blocks."""
    N, H, W, C = x.shape
    TC = 256 if C % 256 == 0 else 128
    xr = x.reshape(N, H * W, C)
    return pl.pallas_call(
        _global_avgpool_kernel,
        out_shape=jax.ShapeDtypeStruct((N, C), jnp.float32),
        grid_spec=pltpu.PrefetchScalarGridSpec(
            num_scalar_prefetch=0,
            grid=(C // TC,),
            in_specs=[pl.BlockSpec((N, H * W, TC), lambda j: (0, 0, j))],
            out_specs=pl.BlockSpec((N, TC), lambda j: (0, j)),
        ),
        compiler_params=pltpu.CompilerParams(
            dimension_semantics=("parallel",)),
    )(xr)


# ------------------------------ parameters ---------------------------------

def _pack_matmul_params(w2d, b):
    """bf16 weights pre-padded to tile boundaries (K mult of 256 / 128)."""
    K, Nn = w2d.shape
    Kp = _round_up(K, 256) if K > 128 else _round_up(K, 128)
    Np = _round_up(Nn, 256) if Nn >= 256 else _round_up(Nn, 128)
    wp = jnp.zeros((Kp, Np), jnp.bfloat16).at[:K, :Nn].set(
        w2d.astype(jnp.bfloat16))
    bp = jnp.zeros((1, Np), jnp.float32).at[0, :Nn].set(b)
    return {'w': wp, 'b': bp, 'n': Nn}


def _pack_tap_params(w4d, b):
    """(k,k,Cin,Cout) -> (k*k, Cin, Np) bf16 per-tap slabs for the conv kernel."""
    k1, k2, cin, Nn = w4d.shape
    Np = _round_up(Nn, 256) if Nn >= 256 else _round_up(Nn, 128)
    wp = jnp.zeros((k1 * k2, cin, Np), jnp.bfloat16)
    wp = wp.at[:, :, :Nn].set(w4d.reshape(k1 * k2, cin, Nn).astype(jnp.bfloat16))
    bp = jnp.zeros((1, Np), jnp.float32).at[0, :Nn].set(b)
    return {'w': wp, 'b': bp, 'n': Nn}


def make_conv_bn_params(key, cin, cout, k):
    std = math.sqrt(2.0 / (k * k * cin))
    w = jax.random.normal(key, (k, k, cin, cout), jnp.float32) * std
    # eval-mode BN folded: y = (conv(x) - mean) / sqrt(var + eps) * gamma + beta
    gamma = jnp.ones((cout,), jnp.float32)
    beta = jnp.zeros((cout,), jnp.float32)
    mean = jnp.zeros((cout,), jnp.float32)
    var = jnp.ones((cout,), jnp.float32)
    scale = gamma / jnp.sqrt(var + 1e-5)
    wf = w * scale
    b = beta - mean * scale
    if k == 3:
        return _pack_tap_params(wf, b)
    return _pack_matmul_params(wf.reshape(k * k * cin, cout), b)


def init_params(key):
    keys = iter(jax.random.split(key, 64))
    params = {'conv1': make_conv_bn_params(next(keys), 3, 64, 7)}
    layers = []
    in_c = 64
    # ResNet-50: (bottleneck width, #blocks, first-block stride)
    for width, blocks, stride in [(64, 3, 1), (128, 4, 2),
                                  (256, 6, 2), (512, 3, 2)]:
        out_c = width * 4
        blks = []
        for bidx in range(blocks):
            s = stride if bidx == 0 else 1
            p = {
                'conv1': make_conv_bn_params(next(keys), in_c, width, 1),
                'conv2': make_conv_bn_params(next(keys), width, width, 3),
                'conv3': make_conv_bn_params(next(keys), width, out_c, 1),
                'stride': s,
            }
            if s != 1 or in_c != out_c:
                p['down'] = make_conv_bn_params(next(keys), in_c, out_c, 1)
            blks.append(p)
            in_c = out_c
        layers.append(blks)
    params['layers'] = layers
    bound = 1.0 / math.sqrt(2048.0)
    fc_w = jax.random.uniform(next(keys), (2048, 1000), jnp.float32,
                              -bound, bound)
    fc_b = jax.random.uniform(next(keys), (1000,), jnp.float32,
                              -bound, bound)
    params['fc'] = _pack_matmul_params(fc_w, fc_b)
    return params


# ------------------------------- forward -----------------------------------

def feature_extraction_forward(params, imgs_nchw):
    # NCHW (PyTorch conv input) -> NHWC for the TPU kernels; bf16 activations
    x = jnp.transpose(imgs_nchw, (0, 2, 3, 1)).astype(jnp.bfloat16)

    # stem: conv7x7/2 + BN + ReLU, maxpool 3x3/2
    x = conv_stem(x, params['conv1'])
    x = maxpool3x3_s2p1(x)

    # layer1..layer4 bottleneck blocks (residual add+ReLU fused into conv3)
    for blks in params['layers']:
        for p in blks:
            s = p['stride']
            if 'down' in p:
                xi = x if s == 1 else x[:, ::s, ::s, :]
                identity = conv1x1_bn(xi, p['down'], relu=False)
            else:
                identity = x
            out = conv1x1_bn(x, p['conv1'], relu=True)
            out = conv3x3_bn(out, p['conv2'], stride=s, relu=True)
            x = conv1x1_bn(out, p['conv3'], relu=True, residual=identity)

    # AdaptiveAvgPool2d(1) + view(N, -1)
    feats = global_avgpool(x)                      # (N, 2048) f32
    # feature_fc: Linear(2048, 1000)
    return matmul_fused(feats, params['fc']['w'], params['fc']['b'],
                        params['fc']['n'], relu=False,
                        out_dtype=jnp.float32)


if __name__ == "__main__":
    key = jax.random.PRNGKey(0)
    pkey, xkey = jax.random.split(key)
    params = init_params(pkey)

    # NCHW input, small spatial size (32x32 -> 1x1 after /32 downsampling)
    imgs = jax.random.normal(xkey, (2, 3, 32, 32), jnp.float32)

    out = feature_extraction_forward(params, imgs)
    out = jax.block_until_ready(out)

    assert out.shape == (2, 1000), out.shape
    assert bool(jnp.all(jnp.isfinite(out)))
    print("KERNEL_OK")
</pallas_src>

<mosaic_0001>
module attributes {stable_mosaic.version = 11 : i64} {
  func.func @_mm_bias_kernel(%arg0: i32, %arg1: i32, %arg2: i32, %arg3: memref<256x256xbf16, #tpu.memory_space<vmem>>, %arg4: memref<256x128xbf16, #tpu.memory_space<vmem>>, %arg5: memref<1x128xf32, #tpu.memory_space<vmem>>, %arg6: memref<256x128xbf16, #tpu.memory_space<vmem>>, %arg7: memref<256x128xf32, #tpu.memory_space<vmem>>) attributes {dimension_semantics = [#tpu.dimension_semantics<parallel>, #tpu.dimension_semantics<parallel>, #tpu.dimension_semantics<arbitrary>], iteration_bounds = array<i64: 2, 1, 1>, scalar_prefetch = 0 : i64, scratch_operands = 1 : i64, tpu.core_type = #tpu.core_type<tc>, window_params = [{transform_indices = @transform_0, window_bounds = array<i64: 256, 256>}, {transform_indices = @transform_1, window_bounds = array<i64: 256, 128>}, {transform_indices = @transform_2, window_bounds = array<i64: 1, 128>}, {transform_indices = @transform_3, window_bounds = array<i64: 256, 128>}]} {
    %c0 = arith.constant 0 : index
    %c0_0 = arith.constant 0 : index
    %0 = vector.load %arg3[%c0, %c0_0] : memref<256x256xbf16, #tpu.memory_space<vmem>>, vector<256x256xbf16>
    %c0_1 = arith.constant 0 : index
    %c0_2 = arith.constant 0 : index
    %1 = vector.load %arg4[%c0_1, %c0_2] : memref<256x128xbf16, #tpu.memory_space<vmem>>, vector<256x128xbf16>
    %cst = arith.constant dense<0.000000e+00> : vector<256x128xf32>
    %2 = tpu.matmul %0, %1, %cst {dimension_numbers = #tpu.dot_dimension_numbers<[1], [0], [0], [1], [0, 0, 1, 1], [], []>} : vector<256x256xbf16>, vector<256x128xbf16>, vector<256x128xf32> -> vector<256x128xf32>
    %c0_i32 = arith.constant 0 : i32
    %3 = arith.cmpi eq, %arg2, %c0_i32 : i32
    %4 = arith.extui %3 : i1 to i32
    %c0_i32_3 = arith.constant 0 : i32
    %5 = arith.cmpi ne, %4, %c0_i32_3 : i32
    scf.if %5 {
      %c0_8 = arith.constant 0 : index
      %c0_9 = arith.constant 0 : index
      %12 = vector.load %arg7[%c0_8, %c0_9] : memref<256x128xf32, #tpu.memory_space<vmem>>, vector<256x128xf32>
      tpu.vector_store %arg7[%c0_8, %c0_9], %2 {strides = array<i32>} : memref<256x128xf32, #tpu.memory_space<vmem>>, vector<256x128xf32>,
    } else {
    }
    %c0_i32_4 = arith.constant 0 : i32
    %6 = arith.cmpi sgt, %arg2, %c0_i32_4 : i32
    %7 = arith.extui %6 : i1 to i32
    %c0_i32_5 = arith.constant 0 : i32
    %8 = arith.cmpi ne, %7, %c0_i32_5 : i32
    scf.if %8 {
      %c0_8 = arith.constant 0 : index
      %c0_9 = arith.constant 0 : index
      %12 = vector.load %arg7[%c0_8, %c0_9] : memref<256x128xf32, #tpu.memory_space<vmem>>, vector<256x128xf32>
      %13 = arith.addf %12, %2 : vector<256x128xf32>
      %c0_10 = arith.constant 0 : index
      %c0_11 = arith.constant 0 : index
      %14 = vector.load %arg7[%c0_10, %c0_11] : memref<256x128xf32, #tpu.memory_space<vmem>>, vector<256x128xf32>
      tpu.vector_store %arg7[%c0_10, %c0_11], %13 {strides = array<i32>} : memref<256x128xf32, #tpu.memory_space<vmem>>, vector<256x128xf32>,
    } else {
    }
    %c0_i32_6 = arith.constant 0 : i32
    %9 = arith.cmpi eq, %arg2, %c0_i32_6 : i32
    %10 = arith.extui %9 : i1 to i32
    %c0_i32_7 = arith.constant 0 : i32
    %11 = arith.cmpi ne, %10, %c0_i32_7 : i32
    scf.if %11 {
      %c0_8 = arith.constant 0 : index
      %c0_9 = arith.constant 0 : index
      %12 = vector.load %arg7[%c0_8, %c0_9] : memref<256x128xf32, #tpu.memory_space<vmem>>, vector<256x128xf32>
      %c0_10 = arith.constant 0 : index
      %c0_11 = arith.constant 0 : index
      %13 = vector.load %arg5[%c0_10, %c0_11] : memref<1x128xf32, #tpu.memory_space<vmem>>, vector<1x128xf32>
      %14 = vector.broadcast %13 : vector<1x128xf32> to vector<256x128xf32>
      %15 = arith.addf %12, %14 : vector<256x128xf32>
      %cst_12 = arith.constant 0.000000e+00 : f32
      %16 = vector.broadcast %cst_12 : f32 to vector<256x128xf32>
      %17 = arith.maximumf %15, %16 : vector<256x128xf32>
      %18 = arith.truncf %17 : vector<256x128xf32> to vector<256x128xbf16>
      %c0_13 = arith.constant 0 : index
      %c0_14 = arith.constant 0 : index
      %19 = vector.load %arg6[%c0_13, %c0_14] : memref<256x128xbf16, #tpu.memory_space<vmem>>, vector<256x128xbf16>
      tpu.vector_store %arg6[%c0_13, %c0_14], %18 {strides = array<i32>} : memref<256x128xbf16, #tpu.memory_space<vmem>>, vector<256x128xbf16>,
    } else {
    }
    return
  }
  func.func @transform_0(%arg0: i32, %arg1: i32, %arg2: i32) -> (i32, i32) {
    %c0_i32 = arith.constant 0 : i32
    return %arg0, %arg2 : i32, i32
  }
  func.func @transform_1(%arg0: i32, %arg1: i32, %arg2: i32) -> (i32, i32) {
    %c0_i32 = arith.constant 0 : i32
    return %arg2, %arg1 : i32, i32
  }
  func.func @transform_2(%arg0: i32, %arg1: i32, %arg2: i32) -> (i32, i32) {
    %c0_i32 = arith.constant 0 : i32
    %c0_i32_0 = arith.constant 0 : i32
    return %c0_i32, %arg1 : i32, i32
  }
  func.func @transform_3(%arg0: i32, %arg1: i32, %arg2: i32) -> (i32, i32) {
    %c0_i32 = arith.constant 0 : i32
    return %arg0, %arg1 : i32, i32
  }
}

</mosaic_0001>

<bundles_post_ra>
// kernel: tpu_custom_call.1
= control target key start
LH: loop header
LB: loop body
LE: loop exit
PB: predicated region body
PF: predicated region fallthrough
CT: control target
= control target key end

     0   :  { %s2096_s0 = inlined_call_operand.hbm [shape: bf16[512,256], index: 0, kind: input, shape index: {}]   ;;  %s2097_s1 = inlined_call_operand.hbm [shape: bf16[256,128], index: 1, kind: input, shape index: {}]   ;;  %s2098_s2 = inlined_call_operand.vmem [shape: f32[1,128], index: 2, kind: input, shape index: {}]   ;;  %s2099_s3 = inlined_call_operand.hbm [shape: bf16[512,128], index: 3, kind: output, shape index: {}]  }
   0x1   :  { %2100 = sst [smem:[#allocation12_spill]] %s2097_s1 }
   0x2   :  { %8 = vsyncpa [#allocation4], 0 }
   0x3   :  { %10 = vsyncpa [#allocation4 + $0x1], 0 }
   0x4   :  { %11 = vsyncpa [#allocation7], 0 }
   0x5   :  { %12 = vsyncpa [#allocation5], 0 }
   0x6   :  { %14 = vsyncpa [#allocation5 + $0x1], 0  ;;  %s1824_s12 = smov 0   ;;  %s1826_s13 = smov 0  }
   0x7   :  { %s1828_s14 = smov 0   ;;  %s1830_s15 = smov 0  }
   0x8   :  { %s1832_s16 = smov 0   ;;  %s1834_s17 = smov 0  }
   0x9 LB: > { %s1196_s18 = sadd.s32 4294967295, %s1795_s17   ;;  %s1197_s19 = sadd.s32 4294967294, %s1795_s17   ;;  %s1795_s17 = sphi %s1834_s17, %s20_s17   ;;  %s1791_s16 = sphi %s1832_s16, %s2113_s16   ;;  %s1787_s15 = sphi %s1830_s15, %s2112_s15   ;;  %s1783_s14 = sphi %s1828_s14, %s2111_s14   ;;  %s1779_s13 = sphi %s1826_s13, %s2110_s13   ;;  %s1775_s12 = sphi %s1824_s12, %s2109_s12  }
   0xa   : > { %p61_p0 = scmp.ne.s32.totalorder %s1779_s13, %s1775_s12  ;;  %p1858_p1 = scmp.eq.s32.totalorder %s1196_s18, 0 }
   0xb   : > { %p1862_p2 = scmp.eq.s32.totalorder %s1196_s18, 1  ;;  %p147_p3 = scmp.eq.s32.totalorder %s1197_s19, 1 }
   0xc   : > { %p1868_p4 = por %p1858_p1, %p61_p0  ;;  %p1198_p5 = scmp.ge.s32.totalorder %s1795_s17, 1 }
   0xd   : > { %p1873_p6 = por %p147_p3, %p61_p0  ;;  %p154_p7 = scmp.lt.s32.totalorder %s1795_s17, 3 }
   0xe   : > { %s2105_s1 = sld [smem:[#allocation12_spill]]  ;;  %s1797_s28 = smov [#allocation6]  }
   0xf   : > { %p1881_p8 = pnand %p1198_p5, %p154_p7  ;;  %s171_s29 = sshll.u32 %s1797_s28, 4  ;;  %s172_s29 = int_to_ptr.vmem [resolvable:$true] %s171_s29 }
  0x10   : > { %p1201_p11 = scmp.ge.s32.totalorder %s1795_s17, 2  ;;  %s1798_s30 = smov 64  }
  0x11   : > { %p1577_p9 = pneg %p1881_p8  ;;  %s1799_s4 = smov 4  }
  0x12   : > { %s39_s5 = sadd.s32 1, %s1791_s16  ;;  %s48_s6 = sadd.s32 1, %s1783_s14 }
  0x13   : > { %p1578_p10 = pnand %p1577_p9, %p1858_p1  ;;  %p41_p12 = scmp.ge.s32.totalorder %s39_s5, 2 }
  0x14   : > { %s169_s26 = sshll.u32 %s2105_s1, 4  ;;  %p55_p13 = scmp.ne.s32.totalorder %s1783_s14, %s1779_s13  ;;  %s170_s26 = int_to_ptr.hbm [resolvable:$true] %s169_s26 }
  0x15   : > { %1580 = dma.hbm_to_vmem [thread:$0]  (!%p1578_p10), %s170_s26, 2048, %s172_s29, [#allocation7], %s1798_s30, %s1798_s30, %s1799_s4  }
  0x16   : > { %p56_p0 = scmp.eq.s32.totalorder %s1795_s17, 0  ;;  %s2115_s5 = smov (%p41_p12, %s39_s5), 0 }
  0x17   : > { %p1903_p5 = por %p1862_p2, %p55_p13  ;;  %s43_s9 = ssub.s32 %s1791_s16, %s2115_s5 }
  0x18   : > { %p1897_p3 = por %p56_p0, %p55_p13  ;;  %p1590_p7 = scmp.lt.s32.totalorder %s1795_s17, 2 }
  0x19   : > { %p46_p9 = scmp.eq.s32.totalorder %s43_s9, 0  ;;  %s191_s10 = sand.u32 1, %s1783_s14  }
  0x1a   : > { %s1202_s11 = sshll.u32 %s191_s10, 8  ;;  %s1408_s19 = sshll.u32 %s1791_s16, 8 }
  0x1b   : > { %s1912_s18 = scalar_select %p46_p9, %s1783_s14, %s48_s6  }
  0x1c   : > { %s203_s26 = scalar_lea.hbm %s2096_s0, %s1408_s19  ;;  %s195_s28 = scalar_lea.vmem [#allocation3], %s1202_s11 }
  0x1d   : > { %s206_s29 = sshll.u32 %s195_s28, 4  ;;  %s204_s21 = sshll.u32 %s203_s26, 4  ;;  %s207_s29 = int_to_ptr.vmem [resolvable:$true] %s206_s29  ;;  %s205_s21 = int_to_ptr.hbm [resolvable:$true] %s204_s21 }
  0x1e   : > { %p1582_p2 = pnand %p1590_p7, %p1897_p3  ;;  %s192_s30 = scalar_lea.sflag [#allocation4], %s191_s10 }
  0x1f   : > { %s1800_s4 = smov 128   ;;  %s1801_s1 = smov 8  }
  0x20   : > { %1584 = dma.hbm_to_vmem [thread:$0]  (!%p1582_p2), %s205_s21, 4096, %s207_s29, %s192_s30, %s1800_s4, %s1800_s4, %s1801_s1  }
  0x21   : > { %218 = sbr.rel (%p1881_p8) target bundleno = 338 (0x152), region = 32  ;;  %s1923_s6 = sand.u32 (!%p1881_p8), 1, %s1779_s13  }
  0x22   : > { %s1207_s9 = sshll.u32 (!%p1881_p8), %s1923_s6, 8  ;;  %s221_s11 = scalar_lea.sflag (!%p1881_p8), [#allocation4], %s1923_s6 }
  0x23   : > { %s1927_s19 = scalar_lea.vmem (!%p1881_p8), [#allocation3], %s1207_s9 }
  0x26   : > { %1762 = dma.done.wait (%p1868_p4), %s221_s11, 4096  }
  0x27   : > { %1764 = vsyncadd (%p1868_p4), %s221_s11, 4294963200 }
  0x28   : > { %1766 = dma.done.wait (%p1858_p1), [#allocation7], 2048  }
  0x29   : > { %1768 = vsyncadd (%p1858_p1), [#allocation7], 4294965248  ;;  %v1448_v0 = vld [vmem:[#allocation6 + $0x38] sm:$0xff]  ;;  %v1447_v2 = vld [vmem:[#allocation6 + $0x30] sm:$0xff]  ;;  %s1209_s22 = sshll.u32 %s1923_s6, 7  ;;  %s1457_s7 = sshll.u32 %s1787_s15, 7 }
  0x2a   : > { %v1456_v1 = vld [vmem:[#allocation6 + $0x78] sm:$0xff]  ;;  %583 = vmatpush.bf16.msra.mxu0 %v1448_v0  ;;  %1553 = vmatpush.bf16.msra.mxu2 %v1448_v0  ;;  %v1455_v3 = vld [vmem:[#allocation6 + $0x70] sm:$0xff]  ;;  %v1446_v4 = vld [vmem:[#allocation6 + $0x28] sm:$0xff]  ;;  %s2010_s27 = scalar_lea.vmem [#allocation8], %s1209_s22  ;;  %s1077_s25 = scalar_lea.hbm %s2099_s3, %s1457_s7 }
  0x2b   : > { %672 = vmatpush.bf16.msra.mxu1 %v1456_v1  ;;  %1561 = vmatpush.bf16.msra.mxu3 %v1456_v1  ;;  %v1454_v5 = vld [vmem:[#allocation6 + $0x68] sm:$0xff]  ;;  %v1445_v6 = vld [vmem:[#allocation6 + $0x20] sm:$0xff]  ;;  %v1444_v8 = vld [vmem:[#allocation6 + $0x18] sm:$0xff]  ;;  %s1078_s26 = sshll.u32 %s2010_s27, 4  ;;  %s1080_s15 = sshll.u32 %s1077_s25, 4  ;;  %s1079_s26 = int_to_ptr.vmem [resolvable:$true] %s1078_s26  ;;  %s1081_s15 = int_to_ptr.hbm [resolvable:$true] %s1080_s15 }
  0x2c   : > { %v1453_v7 = vld [vmem:[#allocation6 + $0x60] sm:$0xff]  ;;  %v1452_v9 = vld [vmem:[#allocation6 + $0x58] sm:$0xff]  ;;  %v1443_v10 = vld [vmem:[#allocation6 + $0x10] sm:$0xff]  ;;  %s1065_s28 = scalar_lea.sflag [#allocation5], %s1923_s6  ;;  %s1723_s29 = sshra.s32 %s1081_s15, 4  ;;  %s1724_s29 = int_to_ptr.hbm [resolvable:$true] %s1723_s29 }
  0x2d   : > { %v1451_v11 = vld [vmem:[#allocation6 + $0x50] sm:$0xff]  ;;  %v1442_v12 = vld [vmem:[#allocation6 + $0x8] sm:$0xff]  ;;  %v1441_v14 = vld [vmem:[#allocation6] sm:$0xff]  ;;  %s1725_s21 = scalar_lea.hbm %s1724_s29, 128  ;;  %s1729_s9 = scalar_lea.hbm %s2099_s3, 256 }
  0x2e   : > { %584 = vmatpush.bf16.msra.mxu0 %v1447_v2  ;;  %1554 = vmatpush.bf16.msra.mxu2 %v1447_v2  ;;  %v1450_v13 = vld [vmem:[#allocation6 + $0x48] sm:$0xff]  ;;  %v1449_v15 = vld [vmem:[#allocation6 + $0x40] sm:$0xff]  ;;  %v1220_v28 = vld [vmem:[%s1927_s19 + $0x10] sm:$0xf]  ;;  %p1726_p1 = scmp.ne.s32.totalorder %s1724_s29, %s1725_s21  ;;  %p1730_p10 = scmp.lt.s32.totalorder %s1724_s29, %s2099_s3 }
  0x2f   : > { %673 = vmatpush.bf16.msra.mxu1 %v1455_v3  ;;  %1562 = vmatpush.bf16.msra.mxu3 %v1455_v3  ;;  %v1212_v16 = vld [vmem:[%s1927_s19] sm:$0xf]  ;;  %v1410_v17 = vld [vmem:[%s1927_s19 + $0x4] sm:$0xf0]  ;;  %v1409_v20 = vld [vmem:[%s1927_s19 + $0x4] sm:$0xf]  ;;  %p1731_p12 = scmp.lt.s32.totalorder %s1729_s9, %s1725_s21 }
  0x30   : > { %v1276_v18 = vld [vmem:[%s1927_s19 + $0x80] sm:$0xf]  ;;  %v1426_v19 = vld [vmem:[%s1927_s19 + $0x84] sm:$0xf0]  ;;  %v1214_v21 = vld [vmem:[%s1927_s19 + $0x8] sm:$0xf0]  ;;  %v1213_v24 = vor.u32 %v1410_v17, %v1212_v16  ;;  %p1727_p4 = pnand %p1726_p1, %p1903_p5 }
  0x31   : > { %v1425_v22 = vld [vmem:[%s1927_s19 + $0x84] sm:$0xf]  ;;  %v1278_v23 = vld [vmem:[%s1927_s19 + $0x88] sm:$0xf0]  ;;  %v1277_v25 = vor.u32 %v1426_v19, %v1276_v18  ;;  %v1217_v26 = vor.u32 %v1409_v20, %v1214_v21  ;;  %v1412_v29 = vld [vmem:[%s1927_s19 + $0x14] sm:$0xf0]  ;;  %p1732_p13 = por %p1731_p12, %p1730_p10 }
  0x32   : > { %585 = vmatpush.bf16.msra.mxu0 %v1446_v4  ;;  %1555 = vmatpush.bf16.msra.mxu2 %v1446_v4  ;;  %v1281_v27 = vor.u32 %v1425_v22, %v1278_v23  ;;  %v1284_v30 = vld [vmem:[%s1927_s19 + $0x90] sm:$0xf]  ;;  %v1428_v31 = vld [vmem:[%s1927_s19 + $0x94] sm:$0xf0]  ;;  %v1411_v32 = vld [vmem:[%s1927_s19 + $0x14] sm:$0xf]  ;;  %v1221_v36 = vor.u32 %v1412_v29, %v1220_v28  ;;  %p1728_p8 = pneg %p1727_p4 }
  0x33   : > { %674 = vmatpush.bf16.msra.mxu1 %v1454_v5  ;;  %1563 = vmatpush.bf16.msra.mxu3 %v1454_v5  ;;  %v1222_v33 = vld [vmem:[%s1927_s19 + $0x18] sm:$0xf0]  ;;  %v1427_v34 = vld [vmem:[%s1927_s19 + $0x94] sm:$0xf]  ;;  %v1285_v37 = vor.u32 %v1428_v31, %v1284_v30  ;;  %v1228_v40 = vld [vmem:[%s1927_s19 + $0x20] sm:$0xf] }
  0x34   : > { %v1286_v35 = vld [vmem:[%s1927_s19 + $0x98] sm:$0xf0]  ;;  %v1225_v38 = vor.u32 %v1411_v32, %v1222_v33  ;;  %v1414_v41 = vld [vmem:[%s1927_s19 + $0x24] sm:$0xf0]  ;;  %v1292_v42 = vld [vmem:[%s1927_s19 + $0xa0] sm:$0xf]  ;;  %p1733_p0 = pnand %p1732_p13, %p1728_p8 }
  0x35   : > { %v1289_v39 = vor.u32 %v1427_v34, %v1286_v35  ;;  %v1430_v43 = vld [vmem:[%s1927_s19 + $0xa4] sm:$0xf0]  ;;  %v1413_v44 = vld [vmem:[%s1927_s19 + $0x24] sm:$0xf]  ;;  %v1230_v45 = vld [vmem:[%s1927_s19 + $0x28] sm:$0xf0]  ;;  %v1229_v48 = vor.u32 %v1414_v41, %v1228_v40 }
  0x36   : > { %586 = vmatpush.bf16.msra.mxu0 %v1445_v6  ;;  %1556 = vmatpush.bf16.msra.mxu2 %v1445_v6  ;;  %v1429_v46 = vld [vmem:[%s1927_s19 + $0xa4] sm:$0xf]  ;;  %v1294_v47 = vld [vmem:[%s1927_s19 + $0xa8] sm:$0xf0]  ;;  %v1293_v49 = vor.u32 %v1430_v43, %v1292_v42  ;;  %v1233_v50 = vor.u32 %v1413_v44, %v1230_v45  ;;  %v1236_v52 = vld [vmem:[%s1927_s19 + $0x30] sm:$0xf] }
  0x37   : > { %675 = vmatpush.bf16.msra.mxu1 %v1453_v7  ;;  %1564 = vmatpush.bf16.msra.mxu3 %v1453_v7  ;;  %v1297_v51 = vor.u32 %v1429_v46, %v1294_v47  ;;  %v1416_v53 = vld [vmem:[%s1927_s19 + $0x34] sm:$0xf0]  ;;  %v1300_v54 = vld [vmem:[%s1927_s19 + $0xb0] sm:$0xf]  ;;  %v1415_v56 = vld [vmem:[%s1927_s19 + $0x34] sm:$0xf] }
  0x38   : > { %v1432_v55 = vld [vmem:[%s1927_s19 + $0xb4] sm:$0xf0]  ;;  %v1238_v57 = vld [vmem:[%s1927_s19 + $0x38] sm:$0xf0]  ;;  %v1431_v58 = vld [vmem:[%s1927_s19 + $0xb4] sm:$0xf]  ;;  %v1237_v60 = vor.u32 %v1416_v53, %v1236_v52 }
  0x39   : > { %v1302_v59 = vld [vmem:[%s1927_s19 + $0xb8] sm:$0xf0]  ;;  %v1301_v61 = vor.u32 %v1432_v55, %v1300_v54  ;;  %v1241_v62 = vor.u32 %v1415_v56, %v1238_v57  ;;  %v1244_v0 = vld [vmem:[%s1927_s19 + $0x40] sm:$0xf]  ;;  %v1418_v1 = vld [vmem:[%s1927_s19 + $0x44] sm:$0xf0] }
  0x3a   : > { %587 = vmatpush.bf16.msra.mxu0 %v1444_v8  ;;  %1557 = vmatpush.bf16.msra.mxu2 %v1444_v8  ;;  %v1305_v63 = vor.u32 %v1431_v58, %v1302_v59  ;;  %v1308_v2 = vld [vmem:[%s1927_s19 + $0xc0] sm:$0xf]  ;;  %v1434_v3 = vld [vmem:[%s1927_s19 + $0xc4] sm:$0xf0]  ;;  %v1417_v4 = vld [vmem:[%s1927_s19 + $0x44] sm:$0xf]  ;;  %v1245_v8 = vor.u32 %v1418_v1, %v1244_v0 }
  0x3b   : > { %676 = vmatpush.bf16.msra.mxu1 %v1452_v9  ;;  %1565 = vmatpush.bf16.msra.mxu3 %v1452_v9  ;;  %v1246_v5 = vld [vmem:[%s1927_s19 + $0x48] sm:$0xf0]  ;;  %v1433_v6 = vld [vmem:[%s1927_s19 + $0xc4] sm:$0xf]  ;;  %v1309_v9 = vor.u32 %v1434_v3, %v1308_v2  ;;  %v1419_v16 = vld [vmem:[%s1927_s19 + $0x54] sm:$0xf] }
  0x3c   : > { %v1310_v7 = vld [vmem:[%s1927_s19 + $0xc8] sm:$0xf0]  ;;  %v1254_v17 = vld [vmem:[%s1927_s19 + $0x58] sm:$0xf0]  ;;  %v1435_v18 = vld [vmem:[%s1927_s19 + $0xd4] sm:$0xf] }
  0x3d   : > { %v1318_v19 = vld [vmem:[%s1927_s19 + $0xd8] sm:$0xf0]  ;;  %v1257_v22 = vor.u32 %v1419_v16, %v1254_v17  ;;  %v1421_v28 = vld [vmem:[%s1927_s19 + $0x64] sm:$0xf]  ;;  %v1262_v29 = vld [vmem:[%s1927_s19 + $0x68] sm:$0xf0] }
  0x3e   : > { %588 = vmatpush.bf16.msra.mxu0 %v1443_v10  ;;  %1558 = vmatpush.bf16.msra.mxu2 %v1443_v10  ;;  %v1249_v10 = vor.u32 %v1417_v4, %v1246_v5  ;;  %v1321_v23 = vor.u32 %v1435_v18, %v1318_v19  ;;  %v1437_v30 = vld [vmem:[%s1927_s19 + $0xe4] sm:$0xf]  ;;  %v1326_v31 = vld [vmem:[%s1927_s19 + $0xe8] sm:$0xf0]  ;;  %v1265_v34 = vor.u32 %v1421_v28, %v1262_v29  ;;  %v1423_v40 = vld [vmem:[%s1927_s19 + $0x74] sm:$0xf] }
  0x3f   : > { %677 = vmatpush.bf16.msra.mxu1 %v1451_v11  ;;  %1566 = vmatpush.bf16.msra.mxu3 %v1451_v11  ;;  %v1313_v11 = vor.u32 %v1433_v6, %v1310_v7  ;;  %v1329_v35 = vor.u32 %v1437_v30, %v1326_v31  ;;  %v1270_v41 = vld [vmem:[%s1927_s19 + $0x78] sm:$0xf0]  ;;  %v1439_v42 = vld [vmem:[%s1927_s19 + $0xf4] sm:$0xf] }
  0x40   : > { %v1334_v43 = vld [vmem:[%s1927_s19 + $0xf8] sm:$0xf0]  ;;  %v1273_v46 = vor.u32 %v1423_v40, %v1270_v41 }
  0x41   : > { %v1337_v47 = vor.u32 %v1439_v42, %v1334_v43 }
  0x42   : > { %589 = vmatpush.bf16.msra.mxu0 %v1442_v12  ;;  %1559 = vmatpush.bf16.msra.mxu2 %v1442_v12  ;;  %v1252_v12 = vld [vmem:[%s1927_s19 + $0x50] sm:$0xf] }
  0x43   : > { %678 = vmatpush.bf16.msra.mxu1 %v1450_v13  ;;  %1567 = vmatpush.bf16.msra.mxu3 %v1450_v13  ;;  %v1420_v13 = vld [vmem:[%s1927_s19 + $0x54] sm:$0xf0] }
  0x44   : > { %v1253_v20 = vor.u32 %v1420_v13, %v1252_v12 }
  0x46   : > { %590 = vmatpush.bf16.msra.mxu0 %v1441_v14  ;;  %1560 = vmatpush.bf16.msra.mxu2 %v1441_v14  ;;  %v1316_v14 = vld [vmem:[%s1927_s19 + $0xd0] sm:$0xf] }
  0x47   : > { %679 = vmatpush.bf16.msra.mxu1 %v1449_v15  ;;  %1568 = vmatpush.bf16.msra.mxu3 %v1449_v15  ;;  %v1436_v15 = vld [vmem:[%s1927_s19 + $0xd4] sm:$0xf0] }
  0x48   : > { %v1317_v21 = vor.u32 %v1436_v15, %v1316_v14 }
  0x49   : > { %591 = vmatmul.bf16.vlgmr.msra.gmra.mxu0 %v1213_v24  ;;  %631 = vmatmul.bf16.vlgmr.msra.gmra.mxu2 %v1277_v25  ;;  %v1260_v24 = vld [vmem:[%s1927_s19 + $0x60] sm:$0xf]  ;;  %v1422_v25 = vld [vmem:[%s1927_s19 + $0x64] sm:$0xf0] }
  0x4a   : > { %680 = vmatmul.bf16.vlgmr.msra.gmra.mxu1 %v1217_v26  ;;  %720 = vmatmul.bf16.vlgmr.msra.gmra.mxu3 %v1281_v27  ;;  %v1324_v26 = vld [vmem:[%s1927_s19 + $0xe0] sm:$0xf]  ;;  %v1438_v27 = vld [vmem:[%s1927_s19 + $0xe4] sm:$0xf0]  ;;  %v1261_v32 = vor.u32 %v1422_v25, %v1260_v24 }
  0x4b   : > { %v1325_v33 = vor.u32 %v1438_v27, %v1324_v26 }
  0x59   : > { %596 = vmatmul.bf16.gmra.mxu0 %v1221_v36  ;;  %636 = vmatmul.bf16.gmra.mxu2 %v1285_v37  ;;  %v1268_v36 = vld [vmem:[%s1927_s19 + $0x70] sm:$0xf]  ;;  %v1424_v37 = vld [vmem:[%s1927_s19 + $0x74] sm:$0xf0] }
  0x5a   : > { %685 = vmatmul.bf16.gmra.mxu1 %v1225_v38  ;;  %725 = vmatmul.bf16.gmra.mxu3 %v1289_v39  ;;  %v1332_v38 = vld [vmem:[%s1927_s19 + $0xf0] sm:$0xf]  ;;  %v1440_v39 = vld [vmem:[%s1927_s19 + $0xf4] sm:$0xf0]  ;;  %v1269_v44 = vor.u32 %v1424_v37, %v1268_v36 }
  0x5b   : > { %v1333_v45 = vor.u32 %v1440_v39, %v1332_v38 }
  0x69   : > { %601 = vmatmul.bf16.gmra.mxu0 %v1229_v48  ;;  %641 = vmatmul.bf16.gmra.mxu2 %v1293_v49 }
  0x6a   : > { %690 = vmatmul.bf16.gmra.mxu1 %v1233_v50  ;;  %730 = vmatmul.bf16.gmra.mxu3 %v1297_v51  ;;  %v2004_v51 = vld [vmem:[%s2098_s2] ss:$0 sm:$0xff] }
  0x79   : > { %606 = vmatmul.bf16.gmra.mxu0 %v1237_v60  ;;  %646 = vmatmul.bf16.gmra.mxu2 %v1301_v61 }
  0x7a   : > { %695 = vmatmul.bf16.gmra.mxu1 %v1241_v62  ;;  %735 = vmatmul.bf16.gmra.mxu3 %v1305_v63 }
  0x89   : > { %611 = vmatmul.bf16.gmra.mxu0 %v1245_v8  ;;  %651 = vmatmul.bf16.gmra.mxu2 %v1309_v9 }
  0x8a   : > { %700 = vmatmul.bf16.gmra.mxu1 %v1249_v10  ;;  %740 = vmatmul.bf16.gmra.mxu3 %v1313_v11 }
  0x99   : > { %616 = vmatmul.bf16.gmra.mxu0 %v1253_v20  ;;  %656 = vmatmul.bf16.gmra.mxu2 %v1317_v21 }
  0x9a   : > { %705 = vmatmul.bf16.gmra.mxu1 %v1257_v22  ;;  %745 = vmatmul.bf16.gmra.mxu3 %v1321_v23 }
  0xa9   : > { %621 = vmatmul.bf16.gmra.mxu0 %v1261_v32  ;;  %661 = vmatmul.bf16.gmra.mxu2 %v1325_v33 }
  0xaa   : > { %710 = vmatmul.bf16.gmra.mxu1 %v1265_v34  ;;  %750 = vmatmul.bf16.gmra.mxu3 %v1329_v35 }
  0xb9   : > { %626 = vmatmul.bf16.gmra.mxu0 %v1269_v44  ;;  %666 = vmatmul.bf16.gmra.mxu2 %v1333_v45 }
  0xba   : > { %715 = vmatmul.bf16.gmra.mxu1 %v1273_v46  ;;  %755 = vmatmul.bf16.gmra.mxu3 %v1337_v47 }
  0xc6   : > { %v592_v48 = vpop.f32.mrf.mxu0 }
  0xc7   : > { %v681_v49 = vpop.f32.mrf.mxu1 }
  0xc8   : > { %v682_v50 = vadd.f32 %v681_v49, %v592_v48 }
  0xca   : > { %v936_v56 = vadd.f32 %v2004_v51, %v682_v50 }
  0xcc   : > { %v632_v52 = vpop.f32.mrf.mxu2  ;;  %v968_v60 = vmax.f32 %v936_v56, 0.0 }
  0xcd   : > { %v721_v53 = vpop.f32.mrf.mxu3 }
  0xce   : > { %v594_v54 = vpop.f32.mrf.mxu0  ;;  %v722_v58 = vadd.f32 %v721_v53, %v632_v52 }
  0xcf   : > { %v683_v55 = vpop.f32.mrf.mxu1 }
  0xd0   : > { %v684_v57 = vadd.f32 %v683_v55, %v594_v54  ;;  %v952_v0 = vadd.f32 %v2004_v51, %v722_v58 }
  0xd2   : > { %v937_v59 = vadd.f32 %v2004_v51, %v684_v57  ;;  %v984_v6 = vmax.f32 %v952_v0, 0.0 }
  0xd4   : > { %v969_v61 = vmax.f32 %v937_v59, 0.0  ;;  %v634_v62 = vpop.f32.mrf.mxu2 }
  0xd5   : > { %v723_v63 = vpop.f32.mrf.mxu3 }
  0xd6   : > { %v1461_v1 = vpack.c.bf16 %v969_v61, %v968_v60  ;;  %v724_v2 = vadd.f32 %v723_v63, %v634_v62  ;;  %v597_v3 = vpop.f32.mrf.mxu0 }
  0xd7   : > { %v686_v4 = vpop.f32.mrf.mxu1 }
  0xd8   : > { %1462 = vst [vmem:[%s2010_s27] sm:$0xff] %v1461_v1   ;;  %v953_v5 = vadd.f32 %v2004_v51, %v724_v2  ;;  %v687_v9 = vadd.f32 %v686_v4, %v597_v3 }
  0xda   : > { %v985_v7 = vmax.f32 %v953_v5, 0.0  ;;  %v938_v14 = vadd.f32 %v2004_v51, %v687_v9 }
  0xdc   : > { %v1501_v8 = vpack.c.bf16 %v985_v7, %v984_v6  ;;  %v637_v10 = vpop.f32.mrf.mxu2  ;;  %v970_v18 = vmax.f32 %v938_v14, 0.0 }
  0xdd   : > { %v726_v11 = vpop.f32.mrf.mxu3 }
  0xde   : > { %1545 = vst [vmem:[%s2010_s27 + $0x40] sm:$0xff] %v1501_v8   ;;  %v599_v12 = vpop.f32.mrf.mxu0  ;;  %v727_v16 = vadd.f32 %v726_v11, %v637_v10 }
  0xdf   : > { %v688_v13 = vpop.f32.mrf.mxu1 }
  0xe0   : > { %v689_v15 = vadd.f32 %v688_v13, %v599_v12  ;;  %v954_v22 = vadd.f32 %v2004_v51, %v727_v16 }
  0xe2   : > { %v939_v17 = vadd.f32 %v2004_v51, %v689_v15  ;;  %v986_v28 = vmax.f32 %v954_v22, 0.0 }
  0xe4   : > { %v971_v19 = vmax.f32 %v939_v17, 0.0  ;;  %v639_v20 = vpop.f32.mrf.mxu2 }
  0xe5   : > { %v728_v21 = vpop.f32.mrf.mxu3 }
  0xe6   : > { %v1466_v23 = vpack.c.bf16 %v971_v19, %v970_v18  ;;  %v729_v24 = vadd.f32 %v728_v21, %v639_v20  ;;  %v602_v25 = vpop.f32.mrf.mxu0 }
  0xe7   : > { %v691_v26 = vpop.f32.mrf.mxu1 }
  0xe8   : > { %1538 = vst [vmem:[%s2010_s27 + $0x8] sm:$0xff] %v1466_v23   ;;  %v955_v27 = vadd.f32 %v2004_v51, %v729_v24  ;;  %v692_v31 = vadd.f32 %v691_v26, %v602_v25 }
  0xea   : > { %v987_v29 = vmax.f32 %v955_v27, 0.0  ;;  %v940_v36 = vadd.f32 %v2004_v51, %v692_v31 }
  0xec   : > { %v1506_v30 = vpack.c.bf16 %v987_v29, %v986_v28  ;;  %v642_v32 = vpop.f32.mrf.mxu2  ;;  %v972_v40 = vmax.f32 %v940_v36, 0.0 }
  0xed   : > { %v731_v33 = vpop.f32.mrf.mxu3 }
  0xee   : > { %1546 = vst [vmem:[%s2010_s27 + $0x48] sm:$0xff] %v1506_v30   ;;  %v604_v34 = vpop.f32.mrf.mxu0  ;;  %v732_v38 = vadd.f32 %v731_v33, %v642_v32 }
  0xef   : > { %v693_v35 = vpop.f32.mrf.mxu1 }
  0xf0   : > { %v694_v37 = vadd.f32 %v693_v35, %v604_v34  ;;  %v956_v44 = vadd.f32 %v2004_v51, %v732_v38 }
  0xf2   : > { %v941_v39 = vadd.f32 %v2004_v51, %v694_v37  ;;  %v988_v50 = vmax.f32 %v956_v44, 0.0 }
  0xf4   : > { %v973_v41 = vmax.f32 %v941_v39, 0.0  ;;  %v644_v42 = vpop.f32.mrf.mxu2 }
  0xf5   : > { %v733_v43 = vpop.f32.mrf.mxu3 }
  0xf6   : > { %v1471_v45 = vpack.c.bf16 %v973_v41, %v972_v40  ;;  %v734_v46 = vadd.f32 %v733_v43, %v644_v42  ;;  %v607_v47 = vpop.f32.mrf.mxu0 }
  0xf7   : > { %v696_v48 = vpop.f32.mrf.mxu1 }
  0xf8   : > { %1539 = vst [vmem:[%s2010_s27 + $0x10] sm:$0xff] %v1471_v45   ;;  %v957_v49 = vadd.f32 %v2004_v51, %v734_v46  ;;  %v697_v54 = vadd.f32 %v696_v48, %v607_v47 }
  0xfa   : > { %v989_v52 = vmax.f32 %v957_v49, 0.0  ;;  %v942_v59 = vadd.f32 %v2004_v51, %v697_v54 }
  0xfc   : > { %v1511_v53 = vpack.c.bf16 %v989_v52, %v988_v50  ;;  %v647_v55 = vpop.f32.mrf.mxu2  ;;  %v974_v63 = vmax.f32 %v942_v59, 0.0 }
  0xfd   : > { %v736_v56 = vpop.f32.mrf.mxu3 }
  0xfe   : > { %1547 = vst [vmem:[%s2010_s27 + $0x50] sm:$0xff] %v1511_v53   ;;  %v609_v57 = vpop.f32.mrf.mxu0  ;;  %v737_v61 = vadd.f32 %v736_v56, %v647_v55 }
  0xff   : > { %v698_v58 = vpop.f32.mrf.mxu1 }
 0x100   : > { %v699_v60 = vadd.f32 %v698_v58, %v609_v57  ;;  %v958_v3 = vadd.f32 %v2004_v51, %v737_v61 }
 0x102   : > { %v943_v62 = vadd.f32 %v2004_v51, %v699_v60  ;;  %v990_v9 = vmax.f32 %v958_v3, 0.0 }
 0x104   : > { %v975_v0 = vmax.f32 %v943_v62, 0.0  ;;  %v649_v1 = vpop.f32.mrf.mxu2 }
 0x105   : > { %v738_v2 = vpop.f32.mrf.mxu3 }
 0x106   : > { %v1476_v4 = vpack.c.bf16 %v975_v0, %v974_v63  ;;  %v739_v5 = vadd.f32 %v738_v2, %v649_v1  ;;  %v612_v6 = vpop.f32.mrf.mxu0 }
 0x107   : > { %v701_v7 = vpop.f32.mrf.mxu1 }
 0x108   : > { %1540 = vst [vmem:[%s2010_s27 + $0x18] sm:$0xff] %v1476_v4   ;;  %v959_v8 = vadd.f32 %v2004_v51, %v739_v5  ;;  %v702_v12 = vadd.f32 %v701_v7, %v612_v6 }
 0x10a   : > { %v991_v10 = vmax.f32 %v959_v8, 0.0  ;;  %v944_v17 = vadd.f32 %v2004_v51, %v702_v12 }
 0x10c   : > { %v1516_v11 = vpack.c.bf16 %v991_v10, %v990_v9  ;;  %v652_v13 = vpop.f32.mrf.mxu2  ;;  %v976_v21 = vmax.f32 %v944_v17, 0.0 }
 0x10d   : > { %v741_v14 = vpop.f32.mrf.mxu3 }
 0x10e   : > { %1548 = vst [vmem:[%s2010_s27 + $0x58] sm:$0xff] %v1516_v11   ;;  %v614_v15 = vpop.f32.mrf.mxu0  ;;  %v742_v19 = vadd.f32 %v741_v14, %v652_v13 }
 0x10f   : > { %v703_v16 = vpop.f32.mrf.mxu1 }
 0x110   : > { %v704_v18 = vadd.f32 %v703_v16, %v614_v15  ;;  %v960_v25 = vadd.f32 %v2004_v51, %v742_v19 }
 0x112   : > { %v945_v20 = vadd.f32 %v2004_v51, %v704_v18  ;;  %v992_v31 = vmax.f32 %v960_v25, 0.0 }
 0x114   : > { %v977_v22 = vmax.f32 %v945_v20, 0.0  ;;  %v654_v23 = vpop.f32.mrf.mxu2 }
 0x115   : > { %v743_v24 = vpop.f32.mrf.mxu3 }
 0x116   : > { %v1481_v26 = vpack.c.bf16 %v977_v22, %v976_v21  ;;  %v744_v27 = vadd.f32 %v743_v24, %v654_v23  ;;  %v617_v28 = vpop.f32.mrf.mxu0 }
 0x117   : > { %v706_v29 = vpop.f32.mrf.mxu1 }
 0x118   : > { %1541 = vst [vmem:[%s2010_s27 + $0x20] sm:$0xff] %v1481_v26   ;;  %v961_v30 = vadd.f32 %v2004_v51, %v744_v27  ;;  %v707_v34 = vadd.f32 %v706_v29, %v617_v28 }
 0x11a   : > { %v993_v32 = vmax.f32 %v961_v30, 0.0  ;;  %v946_v39 = vadd.f32 %v2004_v51, %v707_v34 }
 0x11c   : > { %v1521_v33 = vpack.c.bf16 %v993_v32, %v992_v31  ;;  %v657_v35 = vpop.f32.mrf.mxu2  ;;  %v978_v43 = vmax.f32 %v946_v39, 0.0 }
 0x11d   : > { %v746_v36 = vpop.f32.mrf.mxu3 }
 0x11e   : > { %1549 = vst [vmem:[%s2010_s27 + $0x60] sm:$0xff] %v1521_v33   ;;  %v619_v37 = vpop.f32.mrf.mxu0  ;;  %v747_v41 = vadd.f32 %v746_v36, %v657_v35 }
 0x11f   : > { %v708_v38 = vpop.f32.mrf.mxu1 }
 0x120   : > { %v709_v40 = vadd.f32 %v708_v38, %v619_v37  ;;  %v962_v47 = vadd.f32 %v2004_v51, %v747_v41 }
 0x122   : > { %v947_v42 = vadd.f32 %v2004_v51, %v709_v40  ;;  %v994_v54 = vmax.f32 %v962_v47, 0.0 }
 0x124   : > { %v979_v44 = vmax.f32 %v947_v42, 0.0  ;;  %v659_v45 = vpop.f32.mrf.mxu2 }
 0x125   : > { %v748_v46 = vpop.f32.mrf.mxu3 }
 0x126   : > { %v1486_v48 = vpack.c.bf16 %v979_v44, %v978_v43  ;;  %v749_v49 = vadd.f32 %v748_v46, %v659_v45  ;;  %v622_v50 = vpop.f32.mrf.mxu0 }
 0x127   : > { %v711_v52 = vpop.f32.mrf.mxu1 }
 0x128   : > { %1542 = vst [vmem:[%s2010_s27 + $0x28] sm:$0xff] %v1486_v48   ;;  %v963_v53 = vadd.f32 %v2004_v51, %v749_v49  ;;  %v712_v57 = vadd.f32 %v711_v52, %v622_v50 }
 0x12a   : > { %v995_v55 = vmax.f32 %v963_v53, 0.0  ;;  %v948_v62 = vadd.f32 %v2004_v51, %v712_v57 }
 0x12c   : > { %v1526_v56 = vpack.c.bf16 %v995_v55, %v994_v54  ;;  %v662_v58 = vpop.f32.mrf.mxu2  ;;  %v980_v2 = vmax.f32 %v948_v62, 0.0 }
 0x12d   : > { %v751_v59 = vpop.f32.mrf.mxu3 }
 0x12e   : > { %1550 = vst [vmem:[%s2010_s27 + $0x68] sm:$0xff] %v1526_v56   ;;  %v624_v60 = vpop.f32.mrf.mxu0  ;;  %v752_v0 = vadd.f32 %v751_v59, %v662_v58 }
 0x12f   : > { %v713_v61 = vpop.f32.mrf.mxu1 }
 0x130   : > { %v714_v63 = vadd.f32 %v713_v61, %v624_v60  ;;  %v964_v6 = vadd.f32 %v2004_v51, %v752_v0 }
 0x132   : > { %v949_v1 = vadd.f32 %v2004_v51, %v714_v63  ;;  %v996_v12 = vmax.f32 %v964_v6, 0.0 }
 0x134   : > { %v981_v3 = vmax.f32 %v949_v1, 0.0  ;;  %v664_v4 = vpop.f32.mrf.mxu2 }
 0x135   : > { %v753_v5 = vpop.f32.mrf.mxu3 }
 0x136   : > { %v1491_v7 = vpack.c.bf16 %v981_v3, %v980_v2  ;;  %v754_v8 = vadd.f32 %v753_v5, %v664_v4  ;;  %v627_v9 = vpop.f32.mrf.mxu0 }
 0x137   : > { %v716_v10 = vpop.f32.mrf.mxu1 }
 0x138   : > { %1543 = vst [vmem:[%s2010_s27 + $0x30] sm:$0xff] %v1491_v7   ;;  %v965_v11 = vadd.f32 %v2004_v51, %v754_v8  ;;  %v717_v15 = vadd.f32 %v716_v10, %v627_v9 }
 0x13a   : > { %v997_v13 = vmax.f32 %v965_v11, 0.0  ;;  %v950_v20 = vadd.f32 %v2004_v51, %v717_v15 }
 0x13c   : > { %v1531_v14 = vpack.c.bf16 %v997_v13, %v996_v12  ;;  %v667_v16 = vpop.f32.mrf.mxu2  ;;  %v982_v24 = vmax.f32 %v950_v20, 0.0 }
 0x13d   : > { %v756_v17 = vpop.f32.mrf.mxu3 }
 0x13e   : > { %1551 = vst [vmem:[%s2010_s27 + $0x70] sm:$0xff] %v1531_v14   ;;  %v629_v18 = vpop.f32.mrf.mxu0  ;;  %v757_v22 = vadd.f32 %v756_v17, %v667_v16 }
 0x13f   : > { %v718_v19 = vpop.f32.mrf.mxu1 }
 0x140   : > { %v719_v21 = vadd.f32 %v718_v19, %v629_v18  ;;  %v966_v28 = vadd.f32 %v2004_v51, %v757_v22 }
 0x142   : > { %v951_v23 = vadd.f32 %v2004_v51, %v719_v21  ;;  %v998_v32 = vmax.f32 %v966_v28, 0.0 }
 0x144   : > { %v983_v25 = vmax.f32 %v951_v23, 0.0  ;;  %v669_v26 = vpop.f32.mrf.mxu2 }
 0x145   : > { %v758_v27 = vpop.f32.mrf.mxu3 }
 0x146   : > { %v1496_v29 = vpack.c.bf16 %v983_v25, %v982_v24  ;;  %v759_v30 = vadd.f32 %v758_v27, %v669_v26 }
 0x148   : > { %1544 = vst [vmem:[%s2010_s27 + $0x38] sm:$0xff] %v1496_v29   ;;  %v967_v31 = vadd.f32 %v2004_v51, %v759_v30 }
 0x14a   : > { %v999_v33 = vmax.f32 %v967_v31, 0.0 }
 0x14c   : > { %v1536_v34 = vpack.c.bf16 %v999_v33, %v998_v32 }
 0x14e   : > { %1552 = vst [vmem:[%s2010_s27 + $0x78] sm:$0xff] %v1536_v34  }
 0x14f   : > { %1736 = shalt.err (!%p1733_p0)
}
 0x150   : > { %s1802_s6 = smov 64   ;;  %s1803_s1 = smov 4  }
 0x151   : > { %1575 = dma.vmem_to_hbm [thread:$0]  (%p1903_p5), %s1079_s26, 2048, %s1081_s15, %s1065_s28, %s1802_s6, %s1802_s6, %s1803_s1  }
 0x152 PF: > { %s1095_s20 = sand.u32 1, %s1775_s12   ;;  %p1586_p3 = pnand %p1201_p11, %p1873_p6 }
 0x153   : > { %s1096_s22 = scalar_lea.sflag [#allocation5], %s1095_s20 }
 0x154   : > { %p1587_p7 = pneg %p1586_p3 }
 0x156   : > { %1770 = dma.done.wait (%p1587_p7), %s1096_s22, 2048  }
 0x157   : > { %1772 = vsyncadd (%p1587_p7), %s1096_s22, 4294965248  ;;  %s20_s17 = sadd.s32 1, %s1795_s17   ;;  %s2109_s12 = smov %s1779_s13 }
 0x158   : > { %p17_p9 = scmp.ge.s32.totalorder %s20_s17, 4   ;;  %s2110_s13 = smov %s1783_s14 }
 0x159   : > { %s2111_s14 = smov %s1912_s18  ;;  %s2112_s15 = smov %s1791_s16 }
 0x15a   : > { %s2113_s16 = smov %s2115_s5  ;;  %19 = sbr.rel (!%p17_p9) target bundleno = 9 (0x9), region = 97 }
 0x15f   :  { %1102 = vsyncpa [#allocation4], 1 }
 0x160   :  { %1104 = vsyncpa [#allocation4 + $0x1], 1 }
 0x161   :  { %1105 = vsyncpa [#allocation7], 1 }
 0x162   :  { %1106 = vsyncpa [#allocation5], 1 }
 0x163   :  { %1108 = vsyncpa [#allocation5 + $0x1], 1 }

</bundles_post_ra>
